<compile_context>
chip_gen: v7x
topology: tpu7x:2x2x1
jax: 0.10.0
libtpu: 0.0.40
codegen_flags: <defaults>
</compile_context>

<pallas_src>
import jax
import jax.numpy as jnp
from jax.experimental import pallas as pl
from jax.experimental.pallas import tpu as pltpu


def _round_up(x, m):
    return (x + m - 1) // m * m


def _sublane_multiple(dtype):
    # Packed sublane tile height per dtype width: f32 -> 8, bf16 -> 16, int8/fp8 -> 32.
    itemsize = jnp.dtype(dtype).itemsize
    if itemsize >= 4:
        return 8
    if itemsize == 2:
        return 16
    return 32


def _pick_row_tile(M, H, x_dtype, w_dtype, out_dtype, block_m,
                   vmem_budget_bytes=28 * 1024 * 1024):
    """Pick a dtype-aware row tile that fits a conservative cross-gen VMEM budget."""
    sub = _sublane_multiple(x_dtype)
    x_item = jnp.dtype(x_dtype).itemsize
    w_item = jnp.dtype(w_dtype).itemsize
    o_item = jnp.dtype(out_dtype).itemsize
    if block_m is None:
        block_m = 1024 if x_item <= 2 else 512
    tm = min(_round_up(block_m, sub), _round_up(M, sub))
    tm = max(sub, tm)

    def vmem_bytes(t):
        return (2 * t * H * x_item     # streamed x tile, double-buffered
                + 2 * t * H * o_item   # streamed out tile, double-buffered
                + H * H * w_item       # resident weight, single-buffered
                + 2 * H * 4            # resident bias (padded row)
                + t * H * 4)           # f32 matmul intermediate

    while tm > sub and vmem_bytes(tm) > vmem_budget_bytes:
        tm = max(sub, _round_up(tm // 2, sub))
    return tm, vmem_bytes(tm)


def _self_output_kernel(x_ref, w_ref, b_ref, o_ref):
    # x_ref: [TM, H] streamed token tile
    # w_ref: [H, H]  resident weight in [in, out] layout (pre-transposed in wrapper)
    # b_ref: [1, H]  resident bias row
    # y = x @ W + b, accumulated in f32 on the MXU, cast to output dtype.
    y = jnp.dot(x_ref[...], w_ref[...], preferred_element_type=jnp.float32)
    y = y + b_ref[...].astype(jnp.float32)
    # TODO(synk): training-mode dropout (RNG mask) intentionally not applied;
    #             dropout is identity at inference.
    o_ref[...] = y.astype(o_ref.dtype)


def videomae_self_output(hidden_states, input_tensor, weight, bias, *, block_m=None):
    """VideoMAESelfOutput.forward.

    hidden_states: [B, S, H]; weight: [H, H] (PyTorch nn.Linear, [out, in] layout);
    bias: [H]. input_tensor is accepted for signature parity but unused here -- the
    residual connection is applied in VideoMAELayer, exactly as in the PyTorch module.
    """
    del input_tensor
    B, S, H = hidden_states.shape
    M = B * S
    x = hidden_states.reshape(M, H)
    out_dtype = hidden_states.dtype

    # One-time weight prep (amortized over all row tiles):
    #  * cast to the activation dtype -> native low-precision MXU path, half DMA bytes;
    #  * transpose to [in, out] -> kernel is a plain x @ W (contraction (1, 0)), no
    #    risk of a per-grid-step XLU relayout of the resident weight.
    w = jnp.transpose(weight.astype(x.dtype))
    b2 = bias.reshape(1, H)

    tm, vmem_need = _pick_row_tile(M, H, x.dtype, w.dtype, out_dtype, block_m)
    grid = (pl.cdiv(M, tm),)  # partial trailing block is write-masked by Pallas

    # Explicit scoped-VMEM limit: enough for what we actually allocate (+headroom),
    # capped well below v7x's 64 MiB physical VMEM.
    vmem_limit = int(min(max(vmem_need + (8 << 20), 32 << 20), 48 << 20))

    cost = pl.CostEstimate(
        flops=2 * M * H * H,
        transcendentals=0,
        bytes_accessed=(2 * M * H) * jnp.dtype(out_dtype).itemsize
        + H * H * jnp.dtype(w.dtype).itemsize
        + H * jnp.dtype(bias.dtype).itemsize,
    )

    out = pl.pallas_call(
        _self_output_kernel,
        out_shape=jax.ShapeDtypeStruct((M, H), out_dtype),
        grid=grid,
        in_specs=[
            pl.BlockSpec((tm, H), lambda i: (i, 0)),            # streamed token tiles
            pl.BlockSpec((H, H), lambda i: (0, 0),
                         pipeline_mode=pl.Buffered(1)),          # resident weight, 1 buffer
            pl.BlockSpec((1, H), lambda i: (0, 0),
                         pipeline_mode=pl.Buffered(1)),          # resident bias, 1 buffer
        ],
        out_specs=pl.BlockSpec((tm, H), lambda i: (i, 0)),
        compiler_params=pltpu.CompilerParams(
            dimension_semantics=("parallel",),
            vmem_limit_bytes=vmem_limit,
        ),
        cost_estimate=cost,
    )(x, w, b2)

    return out.reshape(B, S, H)


if __name__ == "__main__":
    key = jax.random.PRNGKey(0)

    # --- Small config consistent with the module: batch=2, seq=8, hidden=32 ---
    B, S, H = 2, 8, 32
    k_x, k_in, k_w, k_b = jax.random.split(key, 4)
    hidden_states = jax.random.normal(k_x, (B, S, H), dtype=jnp.float32)
    input_tensor = jax.random.normal(k_in, (B, S, H), dtype=jnp.float32)
    weight = jax.random.normal(k_w, (H, H), dtype=jnp.float32) * 0.02
    bias = jax.random.normal(k_b, (H,), dtype=jnp.float32) * 0.02

    out = videomae_self_output(hidden_states, input_tensor, weight, bias)
    out = jax.block_until_ready(out)
    ref = (hidden_states.reshape(B * S, H) @ weight.T + bias).reshape(B, S, H)
    assert jnp.allclose(out, ref, atol=1e-5, rtol=1e-5), "mismatch vs reference (small f32)"

    # --- Partial trailing block path: grid > 1, M not a multiple of the tile ---
    B2, S2, H2 = 3, 50, 128   # M = 150, block_m=64 -> 3 grid steps, last block partial
    k2 = jax.random.PRNGKey(1)
    k_x2, k_w2, k_b2 = jax.random.split(k2, 3)
    hs2 = jax.random.normal(k_x2, (B2, S2, H2), dtype=jnp.float32)
    w2 = jax.random.normal(k_w2, (H2, H2), dtype=jnp.float32) * 0.02
    b2 = jax.random.normal(k_b2, (H2,), dtype=jnp.float32) * 0.02

    out2 = jax.block_until_ready(videomae_self_output(hs2, hs2, w2, b2, block_m=64))
    ref2 = (hs2.reshape(B2 * S2, H2) @ w2.T + b2).reshape(B2, S2, H2)
    assert jnp.allclose(out2, ref2, atol=1e-4, rtol=1e-4), "mismatch vs reference (tiled f32)"

    # --- bf16 path: dtype-aware sublane rounding (tile multiple of 16), bf16 MXU ---
    hs3 = hs2.astype(jnp.bfloat16)
    out3 = jax.block_until_ready(videomae_self_output(hs3, hs3, w2, b2, block_m=64))
    ref3 = (hs3.astype(jnp.float32).reshape(B2 * S2, H2)
            @ w2.astype(jnp.bfloat16).astype(jnp.float32).T + b2).reshape(B2, S2, H2)
    assert jnp.allclose(out3.astype(jnp.float32), ref3, atol=2e-2, rtol=2e-2), \
        "mismatch vs reference (bf16)"

    print("KERNEL_OK")
</pallas_src>

<mosaic_0001>
module attributes {stable_mosaic.version = 11 : i64} {
  func.func @_self_output_kernel(%arg0: i32, %arg1: memref<16x32xf32, #tpu.memory_space<vmem>>, %arg2: memref<32x32xf32, #tpu.memory_space<vmem>>, %arg3: memref<1x32xf32, #tpu.memory_space<vmem>>, %arg4: memref<16x32xf32, #tpu.memory_space<vmem>>) attributes {dimension_semantics = [#tpu.dimension_semantics<parallel>], iteration_bounds = array<i64: 1>, scalar_prefetch = 0 : i64, scratch_operands = 0 : i64, tpu.core_type = #tpu.core_type<tc>, window_params = [{transform_indices = @transform_0, window_bounds = array<i64: 16, 32>}, {pipeline_mode = #tpu.pipeline_mode<synchronous>, transform_indices = @transform_1, window_bounds = array<i64: 32, 32>}, {pipeline_mode = #tpu.pipeline_mode<synchronous>, transform_indices = @transform_2, window_bounds = array<i64: 1, 32>}, {transform_indices = @transform_3, window_bounds = array<i64: 16, 32>}]} {
    %c0 = arith.constant 0 : index
    %c0_0 = arith.constant 0 : index
    %0 = vector.load %arg1[%c0, %c0_0] : memref<16x32xf32, #tpu.memory_space<vmem>>, vector<16x32xf32>
    %c0_1 = arith.constant 0 : index
    %c0_2 = arith.constant 0 : index
    %1 = vector.load %arg2[%c0_1, %c0_2] : memref<32x32xf32, #tpu.memory_space<vmem>>, vector<32x32xf32>
    %cst = arith.constant dense<0.000000e+00> : vector<16x32xf32>
    %2 = tpu.matmul %0, %1, %cst {dimension_numbers = #tpu.dot_dimension_numbers<[1], [0], [0], [1], [0, 0, 1, 1], [], []>} : vector<16x32xf32>, vector<32x32xf32>, vector<16x32xf32> -> vector<16x32xf32>
    %c0_3 = arith.constant 0 : index
    %c0_4 = arith.constant 0 : index
    %3 = vector.load %arg3[%c0_3, %c0_4] : memref<1x32xf32, #tpu.memory_space<vmem>>, vector<1x32xf32>
    %4 = vector.broadcast %3 : vector<1x32xf32> to vector<16x32xf32>
    %5 = arith.addf %2, %4 : vector<16x32xf32>
    %c0_5 = arith.constant 0 : index
    %c0_6 = arith.constant 0 : index
    %6 = vector.load %arg4[%c0_5, %c0_6] : memref<16x32xf32, #tpu.memory_space<vmem>>, vector<16x32xf32>
    tpu.vector_store %arg4[%c0_5, %c0_6], %5 {strides = array<i32>} : memref<16x32xf32, #tpu.memory_space<vmem>>, vector<16x32xf32>,
    return
  }
  func.func @transform_0(%arg0: i32) -> (i32, i32) {
    %c0_i32 = arith.constant 0 : i32
    %c0_i32_0 = arith.constant 0 : i32
    return %arg0, %c0_i32 : i32, i32
  }
  func.func @transform_1(%arg0: i32) -> (i32, i32) {
    %c0_i32 = arith.constant 0 : i32
    %c0_i32_0 = arith.constant 0 : i32
    %c0_i32_1 = arith.constant 0 : i32
    return %c0_i32, %c0_i32_0 : i32, i32
  }
  func.func @transform_2(%arg0: i32) -> (i32, i32) {
    %c0_i32 = arith.constant 0 : i32
    %c0_i32_0 = arith.constant 0 : i32
    %c0_i32_1 = arith.constant 0 : i32
    return %c0_i32, %c0_i32_0 : i32, i32
  }
  func.func @transform_3(%arg0: i32) -> (i32, i32) {
    %c0_i32 = arith.constant 0 : i32
    %c0_i32_0 = arith.constant 0 : i32
    return %arg0, %c0_i32 : i32, i32
  }
}

</mosaic_0001>

<bundles_post_ra>
// kernel: tpu_custom_call.1
= control target key start
LH: loop header
LB: loop body
LE: loop exit
PB: predicated region body
PF: predicated region fallthrough
CT: control target
= control target key end

     0   :  { %8 = vsyncpa [#allocation3], 0  ;;  %s340_s0 = inlined_call_operand.hbm [shape: f32[16,32], index: 0, kind: input, shape index: {}]   ;;  %s341_s1 = inlined_call_operand.hbm [shape: f32[32,32], index: 1, kind: input, shape index: {}]   ;;  %s342_s2 = inlined_call_operand.vmem [shape: f32[1,32], index: 2, kind: input, shape index: {}]   ;;  %s343_s3 = inlined_call_operand.hbm [shape: f32[16,32], index: 3, kind: output, shape index: {}]  }
   0x1   :  { %9 = vsyncpa [#allocation6], 0 }
   0x2   :  { %10 = vsyncpa [#allocation4], 0  ;;  %s263_s12 = smov [#allocation2]   ;;  %s191_s16 = scalar_lea.hbm %s340_s0, 256 }
   0x3   :  { %s16_s13 = sshll.u32 %s263_s12, 4  ;;  %p192_p0 = scmp.ne.s32.totalorder %s340_s0, %s191_s16  ;;  %s17_s13 = int_to_ptr.vmem [resolvable:$true] %s16_s13 }
   0x4   :  { %p195_p1 = scmp.lt.u32.totalorder %s191_s16, %s340_s0 }
   0x6   :  { %p197_p2 = pnand %p195_p1, %p192_p0 }
   0x8   :  { %200 = shalt.err (!%p197_p2)
}
   0x9   :  { %s201_s21 = scalar_lea.vmem %s17_s13, 256  ;;  %p206_p4 = scmp.lt.s32.totalorder %s17_s13, %s17_s13 }
   0xa   :  { %p202_p3 = scmp.ne.s32.totalorder %s17_s13, %s201_s21  ;;  %p207_p5 = scmp.lt.s32.totalorder %s201_s21, %s201_s21 }
   0xc   :  { %p208_p6 = por %p207_p5, %p206_p4 }
   0xe   :  { %p209_p7 = pnand %p208_p6, %p202_p3 }
  0x10   :  { %212 = shalt.err (!%p209_p7)
}
  0x11   :  { %s264_s22 = smov 128   ;;  %s265_s23 = smov 8  }
  0x12   :  { %22 = dma.hbm_to_vmem [thread:$0]  %s340_s0, 256, %s17_s13, [#allocation3], %s264_s22, %s264_s22, %s265_s23  }
  0x13   :  { %s266_s26 = smov [#allocation5]   ;;  %s213_s30 = scalar_lea.hbm %s341_s1, 512 }
  0x14   :  { %s28_s27 = sshll.u32 %s266_s26, 4  ;;  %p214_p8 = scmp.ne.s32.totalorder %s341_s1, %s213_s30  ;;  %s29_s27 = int_to_ptr.vmem [resolvable:$true] %s28_s27 }
  0x15   :  { %p217_p9 = scmp.lt.u32.totalorder %s213_s30, %s341_s1 }
  0x17   :  { %p219_p10 = pnand %p217_p9, %p214_p8 }
  0x19   :  { %222 = shalt.err (!%p219_p10)
}
  0x1a   :  { %s223_s8 = scalar_lea.vmem %s29_s27, 512  ;;  %p228_p12 = scmp.lt.s32.totalorder %s29_s27, %s29_s27 }
  0x1b   :  { %p224_p11 = scmp.ne.s32.totalorder %s29_s27, %s223_s8  ;;  %p229_p13 = scmp.lt.s32.totalorder %s223_s8, %s223_s8 }
  0x1d   :  { %p230_p0 = por %p229_p13, %p228_p12 }
  0x1f   :  { %p231_p1 = pnand %p230_p0, %p224_p11 }
  0x21   :  { %234 = shalt.err (!%p231_p1)
}
  0x22   :  { %34 = dma.hbm_to_vmem [thread:$0]  %s341_s1, 512, %s29_s27, [#allocation6], %s264_s22, %s264_s22, %s265_s23  }
  0x23   :  { %257 = dma.done.wait [#allocation3], 256  }
  0x24   :  { %258 = vsyncadd [#allocation3], 4294967040 }
  0x25   :  { %259 = dma.done.wait [#allocation6], 512  }
  0x26   :  { %260 = vsyncadd [#allocation6], 4294966784  ;;  %vm56_vm0 = vcmask 261120   ;;  %v45_v0 = vld [vmem:[#allocation5] sm:$0xff]  ;;  %v46_v1 = vld [vmem:[#allocation5 + $0x8] sm:$0xff]  ;;  %s267_s11 = smov [#allocation7]  }
  0x27   :  { %v47_v2 = vld [vmem:[#allocation5 + $0x10] sm:$0xff]  ;;  %v178_v3 = vpack.c.bf16 %v46_v1, %v45_v0  ;;  %v48_v4 = vld [vmem:[#allocation5 + $0x18] sm:$0xff]  ;;  %s145_s12 = sshll.u32 %s267_s11, 4  ;;  %s146_s12 = int_to_ptr.vmem [resolvable:$true] %s145_s12 }
  0x28   :  { %v43_v5 = vld [vmem:[#allocation2] sm:$0xff]  ;;  %v182_v6 = vpack.c.bf16 %v48_v4, %v47_v2  ;;  %v44_v7 = vld [vmem:[#allocation2 + $0x8] sm:$0xff]  ;;  %s235_s13 = scalar_lea.vmem %s146_s12, 256  ;;  %p240_p3 = scmp.lt.s32.totalorder %s146_s12, %s146_s12 }
  0x29   :  { %175 = vmatprep.mubr.msk.f32.mxu0 %vm56_vm0, %v43_v5  ;;  %179 = vmatprep.subr.bf16.mxu0 %v178_v3  ;;  %v158_v8 = vld [vmem:[%s342_s2] ss:$0 sm:$0xff]  ;;  %p236_p2 = scmp.ne.s32.totalorder %s146_s12, %s235_s13  ;;  %p241_p4 = scmp.lt.s32.totalorder %s235_s13, %s235_s13 }
  0x2a   :  { %181 = vmatpush3.bf16.msra.mxu0 %v178_v3 }
  0x2b   :  { %183 = vmatprep.subr.bf16.mxu0 %v182_v6  ;;  %p242_p5 = por %p241_p4, %p240_p3 }
  0x2d   :  { %p243_p6 = pnand %p242_p5, %p236_p2 }
  0x2e   :  { %185 = vmatpush3.bf16.msra.mxu0 %v182_v6 }
  0x31   :  { %176 = vmatmul.mubr.msk.f32.vlgmr.msra.gmra.mrb[0].mxu0 %vm56_vm0, %v44_v7 }
 0x104   :  { %v177_v9 = vpop.f32.mrb[0].mxu0 }
 0x105   :  { %v135_v10 = vadd.f32 %v177_v9, %v158_v8  ;;  %v129_v11 = vpop.f32.mrb[1].mxu0 }
 0x106   :  { %v130_v12 = vadd.f32 %v158_v8, %v129_v11 }
 0x107   :  { %139 = vst.msk [vmem:[#allocation7 + $0x8] sm:$0xff] %vm56_vm0, %v135_v10 }
 0x108   :  { %138 = vst.msk [vmem:[#allocation7] sm:$0xff] %vm56_vm0, %v130_v12 }
 0x109   :  { %246 = shalt.err (!%p243_p6)
}
 0x10a   :  { %s247_s15 = scalar_lea.hbm %s343_s3, 256 }
 0x10b   :  { %p248_p7 = scmp.ne.s32.totalorder %s343_s3, %s247_s15  ;;  %p251_p8 = scmp.lt.u32.totalorder %s247_s15, %s343_s3 }
 0x10d   :  { %p253_p9 = pnand %p251_p8, %p248_p7 }
 0x10f   :  { %256 = shalt.err (!%p253_p9)
}
 0x110   :  { %151 = dma.vmem_to_hbm [thread:$0]  %s146_s12, 256, %s343_s3, [#allocation4], %s264_s22, %s264_s22, %s265_s23  }
 0x111   :  { %261 = dma.done.wait [#allocation4], 256  }
 0x112   :  { %262 = vsyncadd [#allocation4], 4294967040 }
 0x113   :  { %155 = vsyncpa [#allocation3], 1 }
 0x114   :  { %156 = vsyncpa [#allocation6], 1 }
 0x115   :  { %157 = vsyncpa [#allocation4], 1 }

</bundles_post_ra>
